<compile_context>
chip_gen: v5e
topology: v5e:2x2
jax: 0.10.0
libtpu: 0.0.40
codegen_flags: <defaults>
</compile_context>

<pallas_src>
import jax
import jax.numpy as jnp
from jax import lax
from jax.experimental import pallas as pl
from jax.experimental.pallas import tpu as pltpu

EPS = 1e-5


def _round_up(a, b):
    return (a + b - 1) // b * b


def _vmem_capacity_bytes():
    try:
        cap = getattr(pltpu.get_tpu_info(), "vmem_capacity_bytes", None)
        if cap:
            return int(cap)
    except Exception:
        pass
    return 64 * 1024 * 1024  # conservative default (v7x-sized)


def _plan(K, Cout, HWo, N, recompute):
    """Pick the spatial tile TM, padded spatial extent, and a per-call VMEM limit."""
    cap = _vmem_capacity_bytes()
    vmem_limit = int(min(cap * 3 // 4, 112 * 1024 * 1024))
    budget = int(cap * 0.45)                      # working-set target (double-buffering included)
    fixed = 2 * Cout * K * 2 + (1 << 14)          # resident bf16 weight (double-buffered) + slack
    if recompute:
        per_col = 2 * (K * 2 + Cout * 4)          # pass 2 (patches bf16 in + f32 out) dominates
    else:
        per_col = max(2 * (K * 2 + Cout * 2),     # pass 1: patches in + bf16 conv out
                      2 * (Cout * 2 + Cout * 4))  # pass 2: bf16 conv in + f32 out
    budget_cols = max(256, (budget - fixed) // per_col)

    want_split = (N == 1)  # keep both v7x TensorCores busy when batch alone cannot
    if HWo <= budget_cols and not (want_split and HWo >= 256):
        tm, hwo_pad = HWo, HWo                    # single full-extent tile per image (always legal)
    elif HWo % 128 == 0:
        tm = min(budget_cols, HWo) // 128 * 128
        if want_split:
            tm = min(tm, _round_up(-(-HWo // 2), 128))
        tm = max(tm, 128)
        while HWo % tm:                           # largest 128-multiple divisor <= budget
            tm -= 128
        hwo_pad = HWo                             # no padding -> final slice/reshape is free
    else:
        tm = max(128, min(budget_cols, _round_up(HWo, 128)) // 128 * 128)
        if want_split:
            tm = min(tm, max(128, _round_up(-(-HWo // 2), 128)))
        hwo_pad = _round_up(HWo, tm)

    needed = fixed + per_col * tm + (1 << 20)
    vmem_limit = int(min(max(vmem_limit, needed), cap))
    return tm, hwo_pad, vmem_limit


# ------------------------------- kernels -------------------------------

def _partial_stats(conv):
    s = jnp.sum(conv, axis=1, keepdims=True)              # (Cout, 1)
    sq = jnp.sum(conv * conv, axis=1, keepdims=True)      # (Cout, 1)
    return jnp.concatenate([s, sq], axis=1)                # (Cout, 2) f32


def _conv_stats_kernel(w_ref, p_ref, conv_ref, stats_ref):
    # (Cout, K) @ (K, TM) on the MXU; bf16 operands, f32 accumulation.
    conv = jnp.dot(w_ref[...], p_ref[0], preferred_element_type=jnp.float32)
    conv_ref[0] = conv.astype(conv_ref.dtype)              # bf16 stash (halved HBM traffic)
    stats_ref[0, 0] = _partial_stats(conv)


def _stats_kernel(w_ref, p_ref, stats_ref):
    conv = jnp.dot(w_ref[...], p_ref[0], preferred_element_type=jnp.float32)
    stats_ref[0, 0] = _partial_stats(conv)


def _bn_relu_kernel(conv_ref, scale_ref, shift_ref, o_ref):
    conv = conv_ref[0].astype(jnp.float32)                 # upcast: epilogue stays f32 (v5e-safe)
    y = conv * scale_ref[...] + shift_ref[...]
    o_ref[0] = jnp.maximum(y, 0.0).astype(o_ref.dtype)


def _conv_bn_relu_kernel(w_ref, p_ref, scale_ref, shift_ref, o_ref):
    conv = jnp.dot(w_ref[...], p_ref[0], preferred_element_type=jnp.float32)
    y = conv * scale_ref[...] + shift_ref[...]
    o_ref[0] = jnp.maximum(y, 0.0).astype(o_ref.dtype)


# ------------------------------- forward -------------------------------

def conv_block_forward(x_nchw, w_oihw, gamma, beta, *, stride=2, padding=1):
    N, Cin, H, W = x_nchw.shape
    Cout, _, KH, KW = w_oihw.shape
    Ho = (H + 2 * padding - KH) // stride + 1
    Wo = (W + 2 * padding - KW) // stride + 1
    HWo = Ho * Wo
    K = KH * KW * Cin
    M = N * HWo

    # Recompute the matmul in pass 2 instead of stashing conv when patches are cheaper to re-read.
    recompute = K < 2 * Cout
    TM, HWo_pad, vmem_limit = _plan(K, Cout, HWo, N, recompute)
    n_tiles = HWo_pad // TM

    # --- glue: pad NCHW, take the 9 strided taps, stack along K -> (N, K, Ho*Wo) bf16.
    #     No big transpose; one materialization pass, already in the kernel's (K, M) orientation.
    xp = jnp.pad(x_nchw.astype(jnp.bfloat16),
                 ((0, 0), (0, 0), (padding, padding), (padding, padding)))
    taps = []
    for kh in range(KH):
        for kw in range(KW):
            taps.append(lax.slice(
                xp, (0, 0, kh, kw),
                (N, Cin, kh + stride * (Ho - 1) + 1, kw + stride * (Wo - 1) + 1),
                (1, 1, stride, stride)))                    # (N, Cin, Ho, Wo)
    patches = jnp.stack(taps, axis=1).reshape(N, K, HWo)    # K ordered (kh, kw, cin)
    if HWo_pad != HWo:
        patches = jnp.pad(patches, ((0, 0), (0, 0), (0, HWo_pad - HWo)))  # zero cols -> 0 in stats
    w2d = jnp.transpose(w_oihw, (0, 2, 3, 1)).reshape(Cout, K).astype(jnp.bfloat16)

    cparams = pltpu.CompilerParams(
        dimension_semantics=("parallel", "parallel"),
        vmem_limit_bytes=vmem_limit)
    grid = (N, n_tiles)
    w_spec = pl.BlockSpec((Cout, K), lambda n, t: (0, 0))            # small resident weight
    p_spec = pl.BlockSpec((1, K, TM), lambda n, t: (n, 0, t))        # pipelined patch tiles
    tile_spec = pl.BlockSpec((1, Cout, TM), lambda n, t: (n, 0, t))  # lane-dense conv/out tiles
    stats_spec = pl.BlockSpec((1, 1, Cout, 2), lambda n, t: (n, t, 0, 0))
    stats_shape = jax.ShapeDtypeStruct((N, n_tiles, Cout, 2), jnp.float32)

    # --- pass 1: conv tiles (+ optional bf16 stash) and per-tile BN partial sums ---
    if recompute:
        stats = pl.pallas_call(
            _stats_kernel,
            out_shape=stats_shape,
            grid=grid,
            in_specs=[w_spec, p_spec],
            out_specs=stats_spec,
            compiler_params=cparams,
        )(w2d, patches)
        conv_stash = None
    else:
        conv_stash, stats = pl.pallas_call(
            _conv_stats_kernel,
            out_shape=(jax.ShapeDtypeStruct((N, Cout, HWo_pad), jnp.bfloat16), stats_shape),
            grid=grid,
            in_specs=[w_spec, p_spec],
            out_specs=(tile_spec, stats_spec),
            compiler_params=cparams,
        )(w2d, patches)

    # --- tiny cross-tile BN combine (plain JAX, f32): batch mean + biased variance ---
    tot = jnp.sum(stats, axis=(0, 1))                       # (Cout, 2)
    mean = tot[:, 0] / M
    var = jnp.maximum(tot[:, 1] / M - mean * mean, 0.0)
    inv = lax.rsqrt(var + EPS)
    g32 = gamma.astype(jnp.float32)
    scale = (g32 * inv).reshape(Cout, 1)
    shift = (beta.astype(jnp.float32) - mean * g32 * inv).reshape(Cout, 1)
    ss_spec = pl.BlockSpec((Cout, 1), lambda n, t: (0, 0))
    out_shape = jax.ShapeDtypeStruct((N, Cout, HWo_pad), x_nchw.dtype)

    # --- pass 2: affine + ReLU, written straight in NCHW (no trailing transpose) ---
    if recompute:
        out3d = pl.pallas_call(
            _conv_bn_relu_kernel,
            out_shape=out_shape,
            grid=grid,
            in_specs=[w_spec, p_spec, ss_spec, ss_spec],
            out_specs=tile_spec,
            compiler_params=cparams,
        )(w2d, patches, scale, shift)
    else:
        out3d = pl.pallas_call(
            _bn_relu_kernel,
            out_shape=out_shape,
            grid=grid,
            in_specs=[tile_spec, ss_spec, ss_spec],
            out_specs=tile_spec,
            compiler_params=cparams,
        )(conv_stash, scale, shift)

    if HWo_pad != HWo:
        out3d = out3d[:, :, :HWo]
    return out3d.reshape(N, Cout, Ho, Wo)


# ------------------------------- reference & test -------------------------------

def _reference(x, w, gamma, beta, *, stride=2, padding=1):
    conv = lax.conv_general_dilated(
        x, w, (stride, stride), ((padding, padding), (padding, padding)),
        dimension_numbers=("NCHW", "OIHW", "NCHW"))
    mean = conv.mean(axis=(0, 2, 3), keepdims=True)
    var = ((conv - mean) ** 2).mean(axis=(0, 2, 3), keepdims=True)
    y = (conv - mean) / jnp.sqrt(var + EPS)
    y = y * gamma.reshape(1, -1, 1, 1) + beta.reshape(1, -1, 1, 1)
    return jnp.maximum(y, 0.0)


if __name__ == "__main__":
    fwd = jax.jit(conv_block_forward)
    keys = jax.random.split(jax.random.PRNGKey(0), 6)

    # Case 1 (bf16-stash path, K >= 2*Cout): the module's small reference shapes.
    N, Cin, H, W = 2, 4, 16, 16
    Cout, KH, KW = 8, 3, 3
    x = jax.random.normal(keys[0], (N, Cin, H, W), dtype=jnp.float32)
    bound = 1.0 / (Cin * KH * KW) ** 0.5
    w = jax.random.uniform(keys[1], (Cout, Cin, KH, KW), minval=-bound, maxval=bound,
                           dtype=jnp.float32)
    gamma = jnp.ones((Cout,), jnp.float32)   # BatchNorm2d default weight
    beta = jnp.zeros((Cout,), jnp.float32)   # BatchNorm2d default bias
    out = jax.block_until_ready(fwd(x, w, gamma, beta))
    ref = _reference(x, w, gamma, beta)
    assert out.shape == ref.shape == (N, Cout, 8, 8)
    # bf16 matmul operands + bf16 conv stash (f32 accumulation/statistics) -> relaxed tolerance.
    assert jnp.allclose(out, ref, atol=3e-2, rtol=3e-2), "case1 mismatch vs reference"

    # Case 2 (recompute path, K < 2*Cout) with non-trivial BN affine parameters.
    N2, Cin2, Cout2 = 1, 1, 16
    x2 = jax.random.normal(keys[2], (N2, Cin2, 16, 16), dtype=jnp.float32)
    bound2 = 1.0 / (Cin2 * KH * KW) ** 0.5
    w2 = jax.random.uniform(keys[3], (Cout2, Cin2, KH, KW), minval=-bound2, maxval=bound2,
                            dtype=jnp.float32)
    g2 = 1.0 + 0.1 * jax.random.normal(keys[4], (Cout2,), dtype=jnp.float32)
    b2 = 0.1 * jax.random.normal(keys[5], (Cout2,), dtype=jnp.float32)
    out2 = jax.block_until_ready(fwd(x2, w2, g2, b2))
    ref2 = _reference(x2, w2, g2, b2)
    assert out2.shape == ref2.shape == (N2, Cout2, 8, 8)
    assert jnp.allclose(out2, ref2, atol=3e-2, rtol=3e-2), "case2 mismatch vs reference"

    print("KERNEL_OK")
</pallas_src>

<mosaic_0001>
module attributes {stable_mosaic.version = 11 : i64} {
  func.func @_conv_stats_kernel(%arg0: i32, %arg1: i32, %arg2: memref<8x36xbf16, #tpu.memory_space<vmem>>, %arg3: memref<1x36x64xbf16, #tpu.memory_space<vmem>>, %arg4: memref<1x8x64xbf16, #tpu.memory_space<vmem>>, %arg5: memref<1x1x8x2xf32, #tpu.memory_space<vmem>>) attributes {dimension_semantics = [#tpu.dimension_semantics<parallel>, #tpu.dimension_semantics<parallel>], iteration_bounds = array<i64: 2, 1>, scalar_prefetch = 0 : i64, scratch_operands = 0 : i64, tpu.core_type = #tpu.core_type<tc>, window_params = [{pipeline_mode = #tpu.pipeline_mode<synchronous>, transform_indices = @transform_0, window_bounds = array<i64: 8, 36>}, {transform_indices = @transform_1, window_bounds = array<i64: 1, 36, 64>}, {transform_indices = @transform_2, window_bounds = array<i64: 1, 8, 64>}, {transform_indices = @transform_3, window_bounds = array<i64: 1, 1, 8, 2>}]} {
    %c0 = arith.constant 0 : index
    %c0_0 = arith.constant 0 : index
    %0 = vector.load %arg2[%c0, %c0_0] : memref<8x36xbf16, #tpu.memory_space<vmem>>, vector<8x36xbf16>
    %c0_1 = arith.constant 0 : index
    %c0_2 = arith.constant 0 : index
    %c0_3 = arith.constant 0 : index
    %1 = vector.load %arg3[%c0_1, %c0_2, %c0_3] : memref<1x36x64xbf16, #tpu.memory_space<vmem>>, vector<1x36x64xbf16>
    %2 = vector.shape_cast %1 : vector<1x36x64xbf16> to vector<36x64xbf16>
    %cst = arith.constant dense<0.000000e+00> : vector<8x64xf32>
    %3 = tpu.matmul %0, %2, %cst {dimension_numbers = #tpu.dot_dimension_numbers<[1], [0], [0], [1], [0, 0, 1, 1], [], []>} : vector<8x36xbf16>, vector<36x64xbf16>, vector<8x64xf32> -> vector<8x64xf32>
    %4 = arith.truncf %3 : vector<8x64xf32> to vector<8x64xbf16>
    %c0_4 = arith.constant 0 : index
    %c0_5 = arith.constant 0 : index
    %c0_6 = arith.constant 0 : index
    %5 = vector.load %arg4[%c0_4, %c0_5, %c0_6] : memref<1x8x64xbf16, #tpu.memory_space<vmem>>, vector<1x8x64xbf16>
    %6 = vector.shape_cast %5 : vector<1x8x64xbf16> to vector<8x64xbf16>
    %7 = vector.shape_cast %4 : vector<8x64xbf16> to vector<1x8x64xbf16>
    tpu.vector_store %arg4[%c0_4, %c0_5, %c0_6], %7 {strides = array<i32>} : memref<1x8x64xbf16, #tpu.memory_space<vmem>>, vector<1x8x64xbf16>,
    %cst_7 = arith.constant dense<0.000000e+00> : vector<8xf32>
    %8 = vector.multi_reduction <add>, %3, %cst_7 [1] : vector<8x64xf32> to vector<8xf32>
    %9 = vector.shape_cast %8 : vector<8xf32> to vector<8x1xf32>
    %10 = arith.mulf %3, %3 : vector<8x64xf32>
    %cst_8 = arith.constant dense<0.000000e+00> : vector<8xf32>
    %11 = vector.multi_reduction <add>, %10, %cst_8 [1] : vector<8x64xf32> to vector<8xf32>
    %12 = vector.shape_cast %11 : vector<8xf32> to vector<8x1xf32>
    %13 = tpu.concatenate %9, %12 in 1 : vector<8x1xf32>, vector<8x1xf32> -> vector<8x2xf32>
    %c0_9 = arith.constant 0 : index
    %c0_10 = arith.constant 0 : index
    %c0_11 = arith.constant 0 : index
    %c0_12 = arith.constant 0 : index
    %14 = vector.load %arg5[%c0_9, %c0_10, %c0_11, %c0_12] : memref<1x1x8x2xf32, #tpu.memory_space<vmem>>, vector<1x1x8x2xf32>
    %15 = vector.shape_cast %14 : vector<1x1x8x2xf32> to vector<8x2xf32>
    %16 = vector.shape_cast %13 : vector<8x2xf32> to vector<1x1x8x2xf32>
    tpu.vector_store %arg5[%c0_9, %c0_10, %c0_11, %c0_12], %16 {strides = array<i32>} : memref<1x1x8x2xf32, #tpu.memory_space<vmem>>, vector<1x1x8x2xf32>,
    return
  }
  func.func @transform_0(%arg0: i32, %arg1: i32) -> (i32, i32) {
    %c0_i32 = arith.constant 0 : i32
    %c0_i32_0 = arith.constant 0 : i32
    %c0_i32_1 = arith.constant 0 : i32
    return %c0_i32, %c0_i32_0 : i32, i32
  }
  func.func @transform_1(%arg0: i32, %arg1: i32) -> (i32, i32, i32) {
    %c0_i32 = arith.constant 0 : i32
    %c0_i32_0 = arith.constant 0 : i32
    return %arg0, %c0_i32, %arg1 : i32, i32, i32
  }
  func.func @transform_2(%arg0: i32, %arg1: i32) -> (i32, i32, i32) {
    %c0_i32 = arith.constant 0 : i32
    %c0_i32_0 = arith.constant 0 : i32
    return %arg0, %c0_i32, %arg1 : i32, i32, i32
  }
  func.func @transform_3(%arg0: i32, %arg1: i32) -> (i32, i32, i32, i32) {
    %c0_i32 = arith.constant 0 : i32
    %c0_i32_0 = arith.constant 0 : i32
    %c0_i32_1 = arith.constant 0 : i32
    return %arg0, %arg1, %c0_i32, %c0_i32_0 : i32, i32, i32, i32
  }
}

module attributes {stable_mosaic.version = 11 : i64} {
  func.func @_bn_relu_kernel(%arg0: i32, %arg1: i32, %arg2: memref<1x8x64xbf16, #tpu.memory_space<vmem>>, %arg3: memref<8x1xf32, #tpu.memory_space<vmem>>, %arg4: memref<8x1xf32, #tpu.memory_space<vmem>>, %arg5: memref<1x8x64xf32, #tpu.memory_space<vmem>>) attributes {dimension_semantics = [#tpu.dimension_semantics<parallel>, #tpu.dimension_semantics<parallel>], iteration_bounds = array<i64: 2, 1>, scalar_prefetch = 0 : i64, scratch_operands = 0 : i64, tpu.core_type = #tpu.core_type<tc>, window_params = [{transform_indices = @transform_0, window_bounds = array<i64: 1, 8, 64>}, {pipeline_mode = #tpu.pipeline_mode<synchronous>, transform_indices = @transform_1, window_bounds = array<i64: 8, 1>}, {pipeline_mode = #tpu.pipeline_mode<synchronous>, transform_indices = @transform_2, window_bounds = array<i64: 8, 1>}, {transform_indices = @transform_3, window_bounds = array<i64: 1, 8, 64>}]} {
    %c0 = arith.constant 0 : index
    %c0_0 = arith.constant 0 : index
    %c0_1 = arith.constant 0 : index
    %0 = vector.load %arg2[%c0, %c0_0, %c0_1] : memref<1x8x64xbf16, #tpu.memory_space<vmem>>, vector<1x8x64xbf16>
    %1 = vector.shape_cast %0 : vector<1x8x64xbf16> to vector<8x64xbf16>
    %2 = arith.extf %1 : vector<8x64xbf16> to vector<8x64xf32>
    %c0_2 = arith.constant 0 : index
    %c0_3 = arith.constant 0 : index
    %3 = vector.load %arg3[%c0_2, %c0_3] : memref<8x1xf32, #tpu.memory_space<vmem>>, vector<8x1xf32>
    %4 = vector.broadcast %3 : vector<8x1xf32> to vector<8x64xf32>
    %5 = arith.mulf %2, %4 : vector<8x64xf32>
    %c0_4 = arith.constant 0 : index
    %c0_5 = arith.constant 0 : index
    %6 = vector.load %arg4[%c0_4, %c0_5] : memref<8x1xf32, #tpu.memory_space<vmem>>, vector<8x1xf32>
    %7 = vector.broadcast %6 : vector<8x1xf32> to vector<8x64xf32>
    %8 = arith.addf %5, %7 : vector<8x64xf32>
    %cst = arith.constant 0.000000e+00 : f32
    %9 = vector.broadcast %cst : f32 to vector<8x64xf32>
    %10 = arith.maximumf %8, %9 : vector<8x64xf32>
    %c0_6 = arith.constant 0 : index
    %c0_7 = arith.constant 0 : index
    %c0_8 = arith.constant 0 : index
    %11 = vector.load %arg5[%c0_6, %c0_7, %c0_8] : memref<1x8x64xf32, #tpu.memory_space<vmem>>, vector<1x8x64xf32>
    %12 = vector.shape_cast %11 : vector<1x8x64xf32> to vector<8x64xf32>
    %13 = vector.shape_cast %10 : vector<8x64xf32> to vector<1x8x64xf32>
    tpu.vector_store %arg5[%c0_6, %c0_7, %c0_8], %13 {strides = array<i32>} : memref<1x8x64xf32, #tpu.memory_space<vmem>>, vector<1x8x64xf32>,
    return
  }
  func.func @transform_0(%arg0: i32, %arg1: i32) -> (i32, i32, i32) {
    %c0_i32 = arith.constant 0 : i32
    %c0_i32_0 = arith.constant 0 : i32
    return %arg0, %c0_i32, %arg1 : i32, i32, i32
  }
  func.func @transform_1(%arg0: i32, %arg1: i32) -> (i32, i32) {
    %c0_i32 = arith.constant 0 : i32
    %c0_i32_0 = arith.constant 0 : i32
    %c0_i32_1 = arith.constant 0 : i32
    return %c0_i32, %c0_i32_0 : i32, i32
  }
  func.func @transform_2(%arg0: i32, %arg1: i32) -> (i32, i32) {
    %c0_i32 = arith.constant 0 : i32
    %c0_i32_0 = arith.constant 0 : i32
    %c0_i32_1 = arith.constant 0 : i32
    return %c0_i32, %c0_i32_0 : i32, i32
  }
  func.func @transform_3(%arg0: i32, %arg1: i32) -> (i32, i32, i32) {
    %c0_i32 = arith.constant 0 : i32
    %c0_i32_0 = arith.constant 0 : i32
    return %arg0, %c0_i32, %arg1 : i32, i32, i32
  }
}

</mosaic_0001>

<bundles_post_ra>
// kernel: conv_block_forward.3
= control target key start
LH: loop header
LB: loop body
LE: loop exit
PB: predicated region body
PF: predicated region fallthrough
CT: control target
= control target key end

     0   :  { %s370_s12 = smov 0   ;;  %s372_s13 = smov 0   ;;  %s406_s0 = inlined_call_operand.vmem [shape: bf16[2,8,64], index: 0, kind: input, shape index: {}]   ;;  %s407_s1 = inlined_call_operand.vmem [shape: f32[8,1], index: 1, kind: input, shape index: {}]   ;;  %s408_s2 = inlined_call_operand.vmem [shape: f32[8,1], index: 2, kind: input, shape index: {}]   ;;  %s409_s3 = inlined_call_operand.vmem [shape: f32[2,8,64], index: 3, kind: output, shape index: {}]  }
   0x1   :  { %s374_s14 = smov 0  }
   0x2 LB: > { %s25_s15 = sadd.s32 1, %s343_s13  ;;  %p294_p0 = scmp.ge.s32.totalorder %s347_s14, 1  ;;  %s347_s14 = sphi %s374_s14, %s13_s14   ;;  %s343_s13 = sphi %s372_s13, %s411_s13   ;;  %s339_s12 = sphi %s370_s12, %s410_s12  }
   0x3   : > { %p27_p1 = scmp.ge.s32.totalorder %s25_s15, 2  ;;  %p155_p2 = scmp.lt.s32.totalorder %s347_s14, 3 }
   0x5   : > { %s413_s15 = smov (%p27_p1, %s25_s15), 0  ;;  %p156_p3 = pnand %p294_p0, %p155_p2 }
   0x6   : > { %p183_p4 = scmp.lt.s32.totalorder (!%p156_p3), %s339_s12, 1 }
   0x7   : > { %159 = sbr.rel (%p156_p3) target bundleno = 142 (0x8e), region = 32 }
   0xc   : > { %v199_v0 = vld [vmem:[%s407_s1] sm:$0xff]  ;;  %v349_v1 = vmov 0   ;;  %s415_s12 = smov (!%p183_p4, %s339_s12), 1  ;;  %vm214_vm0 = vcmask 523264  }
   0xd   : > { %324 = vset.pattern.permute.xlu0 %v349_v1  ;;  %v206_v2 = vld [vmem:[%s408_s2] sm:$0xff]  ;;  %s295_s20 = sshll.u32 %s415_s12, 2  ;;  %s296_s24 = sshll.u32 %s415_s12, 3 }
   0xe   : > { %202 = vperm.xlu0 %324, %v199_v0   ;;  %s189_s23 = scalar_lea.vmem %s406_s0, %s295_s20  ;;  %s196_s27 = scalar_lea.vmem %s409_s3, %s296_s24 }
   0xf   : > { %v197_v4 = vld [vmem:[%s189_s23] sm:$0xf] }
  0x10   : > { %v198_v5 = vunpack.c.l.bf16 %v197_v4 }
  0x16   : > { %209 = vperm.xlu0 %324, %v206_v2  }
  0x80   : > { %v203_v3 = vpop.permute.xlu0 %202 }
  0x81   : > { %v205_v6 = vmul.f32 %v203_v3, %v198_v5 }
  0x88   : > { %v210_v7 = vpop.permute.xlu0 %209 }
  0x89   : > { %v212_v8 = vadd.f32 %v210_v7, %v205_v6 }
  0x8b   : > { %v213_v9 = vmax.f32 %v212_v8, 0.0 }
  0x8d   : > { %215 = vst.msk [vmem:[%s196_s27] sm:$0xff] %vm214_vm0, %v213_v9 }
  0x8e PF: > { %s13_s14 = sadd.s32 1, %s347_s14   ;;  %s410_s12 = smov %s343_s13 }
  0x8f   : > { %p10_p5 = scmp.ge.s32.totalorder %s13_s14, 4   ;;  %s411_s13 = smov %s413_s15 }
  0x91   :  { %12 = sbr.rel (!%p10_p5) target bundleno = 2 (0x2), region = 62 }

// kernel: conv_block_forward.2
= control target key start
LH: loop header
LB: loop body
LE: loop exit
PB: predicated region body
PF: predicated region fallthrough
CT: control target
= control target key end

     0   :  { %s485_s12 = smov 0   ;;  %s487_s13 = smov 0   ;;  %s529_s0 = inlined_call_operand.vmem [shape: bf16[8,36], index: 0, kind: input, shape index: {}]   ;;  %s530_s1 = inlined_call_operand.vmem [shape: bf16[2,36,64], index: 1, kind: input, shape index: {}]   ;;  %s531_s2 = inlined_call_operand.vmem [shape: bf16[2,8,64], index: 2, kind: output, shape index: {0}]   ;;  %s532_s3 = inlined_call_operand.vmem [shape: f32[2,1,8,2], index: 3, kind: output, shape index: {1}]  }
   0x1   :  { %s489_s14 = smov 0  }
   0x2 LB: > { %s26_s15 = sadd.s32 1, %s459_s13  ;;  %p399_p0 = scmp.ge.s32.totalorder %s463_s14, 1  ;;  %s463_s14 = sphi %s489_s14, %s14_s14   ;;  %s459_s13 = sphi %s487_s13, %s534_s13   ;;  %s455_s12 = sphi %s485_s12, %s533_s12  }
   0x3   : > { %p28_p1 = scmp.ge.s32.totalorder %s26_s15, 2  ;;  %p161_p2 = scmp.lt.s32.totalorder %s463_s14, 3 }
   0x5   : > { %s536_s15 = smov (%p28_p1, %s26_s15), 0  ;;  %p162_p3 = pnand %p399_p0, %p161_p2 }
   0x6   : > { %p197_p4 = scmp.lt.s32.totalorder (!%p162_p3), %s455_s12, 1 }
   0x7   : > { %165 = sbr.rel (%p162_p3) target bundleno = 286 (0x11e), region = 28 }
   0xc   : > { %s538_s12 = smov (!%p197_p4, %s455_s12), 1  ;;  %vm245_vm0 = vcmask 1041408   ;;  %v220_v6 = vld [vmem:[%s529_s0] sm:$0xf]  ;;  %vm241_vm1 = vcmask 293888   ;;  %vm265_vm2 = vcmask 523264  }
   0xd   : > { %s416_s16 = smul.u32 20, %s538_s12  ;;  %s401_s22 = sshll.u32 %s538_s12, 2  ;;  %vm263_vm3 = vcmask 519168   ;;  %vm273_vm4 = vcmask 7168   ;;  %vm275_vm5 = vcmask 15360  }
   0xe   : > { %s211_s25 = scalar_lea.vmem %s531_s2, %s401_s22  ;;  %s402_s26 = sshll.u32 %s538_s12, 3 }
   0xf   : > { %s204_s19 = scalar_lea.vmem %s530_s1, %s416_s16  ;;  %s218_s29 = scalar_lea.vmem %s532_s3, %s402_s26 }
  0x10   : > { %v225_v0 = vld [vmem:[%s204_s19 + $0x10] sm:$0x3]  ;;  %v415_v4 = vld [vmem:[%s204_s19 + $0x8] sm:$0xff]  ;;  %v414_v5 = vld [vmem:[%s204_s19] sm:$0xff] }
  0x11   : > { %v235_v1 = vunpack.c.l.b16 %v225_v0 }
  0x13   : > { %v238_v2 = vpack.c.b16 %v235_v1, %v235_v1 }
  0x15   : > { %v247_v3 = vsel %vm245_vm0, %v238_v2, 0 }
  0x16   : > { %254 = vmatpush.bf16.msra.mxu0 %v247_v3 }
  0x1a   : > { %255 = vmatpush.bf16.msra.mxu0 %v415_v4 }
  0x1e   : > { %256 = vmatpush.bf16.msra.mxu0 %v414_v5 }
  0x21   : > { %411 = vmatmul.msk.bf16.vlgmr.msra.gmra.mxu0 %vm241_vm1, %v220_v6 }
  0x9e   : > { %v258_v7 = vpop.f32.mrf.mxu0 }
  0x9f   : > { %v262_v8 = vpack.c.bf16 %v258_v7, %v258_v7  ;;  %v266_v9 = vsel %vm265_vm2, %v258_v7, 0.0  ;;  %v269_v10 = vmul.f32 %v258_v7, %v258_v7 }
  0xa0   : > { %267 = vadd.xlane.f32.xlu0 %v266_v9 }
  0xa1   : > { %264 = vst.msk [vmem:[%s211_s25] sm:$0xf] %vm263_vm3, %v262_v8  ;;  %v270_v12 = vsel %vm265_vm2, %v269_v10, 0.0 }
  0xa6   : > { %v260_v11 = vpop.f32.mrf.mxu0 }
  0xa8   : > { %271 = vadd.xlane.f32.xlu0 %v270_v12 }
 0x113   : > { %v268_v13 = vpop.xlane.xlu0 %267 }
 0x11b   : > { %v272_v14 = vpop.xlane.xlu0 %271 }
 0x11c   : > { %v274_v15 = vsel %vm273_vm4, %v268_v13, %v272_v14 }
 0x11d   : > { %276 = vst.msk [vmem:[%s218_s29] sm:$0xff] %vm275_vm5, %v274_v15 }
 0x11e PF: > { %s14_s14 = sadd.s32 1, %s463_s14   ;;  %s533_s12 = smov %s459_s13 }
 0x11f   : > { %p11_p5 = scmp.ge.s32.totalorder %s14_s14, 4   ;;  %s534_s13 = smov %s536_s15 }
 0x121   :  { %13 = sbr.rel (!%p11_p5) target bundleno = 2 (0x2), region = 70 }

</bundles_post_ra>
